<compile_context>
chip_gen: v5e
topology: v5e:2x2
jax: 0.10.0
libtpu: 0.0.40
codegen_flags: <defaults>
</compile_context>

<pallas_src>
import math
from functools import partial

import jax
import jax.numpy as jnp
from jax.experimental import pallas as pl
from jax.experimental.pallas import tpu as pltpu


def _bert_attention_kernel(
    x_ref, mask_ref,
    wqkv_ref, bqkv_ref, wo_ref, bo_ref, gamma_ref, beta_ref,
    out_ref,
    k_sc, v_sc, ctx_sc,
    *, num_heads, head_dim, hidden, seq_len, q_tile, eps,
):
    H = hidden
    single_tile = (q_tile == seq_len)

    if single_tile:
        # One fused (S,H)x(H,3H) MXU matmul produces Q|K|V for the whole batch row.
        x_t = x_ref[0]                                              # (S, H) f32 residual
        x16 = x_t.astype(jnp.bfloat16)
        qkv = jnp.dot(x16, wqkv_ref[...],
                      preferred_element_type=jnp.float32) + bqkv_ref[...]
        q16 = qkv[:, :H].astype(jnp.bfloat16)                       # 1/sqrt(d) folded into wq/bq
        k16 = qkv[:, H:2 * H].astype(jnp.bfloat16)
        v16 = qkv[:, 2 * H:].astype(jnp.bfloat16)
    else:
        qi = pl.program_id(1)

        # K/V computed ONCE per batch (qi == 0), cached in bf16 VMEM scratch and
        # reused by every query tile.  Downcast immediately: no f32 (S,2H) kept.
        @pl.when(qi == 0)
        def _compute_kv():
            xs16 = x_ref[0].astype(jnp.bfloat16)                    # (S, H)
            k = jnp.dot(xs16, wqkv_ref[:, H:2 * H],
                        preferred_element_type=jnp.float32) + bqkv_ref[:, H:2 * H]
            k_sc[...] = k.astype(jnp.bfloat16)
            v = jnp.dot(xs16, wqkv_ref[:, 2 * H:],
                        preferred_element_type=jnp.float32) + bqkv_ref[:, 2 * H:]
            v_sc[...] = v.astype(jnp.bfloat16)

        row0 = pl.multiple_of(qi * q_tile, q_tile)
        x_t = x_ref[0, pl.ds(row0, q_tile), :]                      # (TQ, H) f32 residual
        q = jnp.dot(x_t.astype(jnp.bfloat16), wqkv_ref[:, :H],
                    preferred_element_type=jnp.float32) + bqkv_ref[:, :H]
        q16 = q.astype(jnp.bfloat16)
        k16 = k_sc[...]
        v16 = v_sc[...]

    # Hoisted mask broadcast (1,S) -> (TQ,S): done once, not once per head.
    mask_b = jnp.broadcast_to(mask_ref[0], (q_tile, seq_len))

    # Per-head attention.  Each head's context goes straight into its lane slice
    # of a bf16 VMEM scratch buffer (static slices), bounding live ranges.
    # TODO(synk): switch to lax.fori_loop over heads for very large head counts.
    for h in range(num_heads):
        lo = h * head_dim
        hi = lo + head_dim
        qh = q16[:, lo:hi]                                          # (TQ, Dh) bf16
        kh = k16[:, lo:hi]                                          # (S,  Dh) bf16
        vh = v16[:, lo:hi]                                          # (S,  Dh) bf16
        s = jax.lax.dot_general(qh, kh, (((1,), (1,)), ((), ())),
                                preferred_element_type=jnp.float32) + mask_b
        s = s - jnp.max(s, axis=-1, keepdims=True)
        p = jnp.exp(s)                                              # f32 softmax
        p = p * pl.reciprocal(jnp.sum(p, axis=-1, keepdims=True), approx=True)
        # TODO(synk): attention_probs dropout / head_mask omitted (eval mode).
        ctx_sc[:, lo:hi] = jnp.dot(p.astype(jnp.bfloat16), vh,
                                   preferred_element_type=jnp.float32
                                   ).astype(jnp.bfloat16)

    # BertSelfOutput: ONE full-contraction (TQ,H)x(H,H) output projection,
    # + bias, + residual, LayerNorm (all f32).
    y = jnp.dot(ctx_sc[...], wo_ref[...], preferred_element_type=jnp.float32)
    y = y + bo_ref[...] + x_t
    mean = jnp.mean(y, axis=-1, keepdims=True)
    var = jnp.mean((y - mean) ** 2, axis=-1, keepdims=True)
    y = (y - mean) * jax.lax.rsqrt(var + eps)
    out_ref[0] = (y * gamma_ref[...] + beta_ref[...]).astype(out_ref.dtype)


def _const_spec(shape):
    """Constant-index (VMEM-resident) spec; single-buffered when supported."""
    idx = lambda b, qi: (0,) * len(shape)
    try:
        return pl.BlockSpec(shape, idx, pipeline_mode=pl.Buffered(1))
    except Exception:   # older JAX without pipeline_mode / Buffered
        return pl.BlockSpec(shape, idx)


def _default_vmem_limit_bytes():
    # ~85% of per-core VMEM: ~54 MiB on v7x (64 MiB/TC), ~108 MiB on v5e/v6e
    # (128 MiB), leaving headroom for compiler-internal scratch.
    try:
        cap = pltpu.get_tpu_info().vmem_capacity_bytes
    except Exception:
        cap = 64 * 1024 * 1024          # conservative (v7x-sized) fallback
    return int(cap * 0.85)


def pack_params(params, *, num_heads):
    """One-time parameter packing (do NOT call per forward pass).

    Concatenates Q/K/V into a single (H, 3H) bf16 weight / (1, 3H) f32 bias,
    folds 1/sqrt(head_dim) into the query weight+bias, casts the output
    projection weight to bf16.
    """
    wq, bq, wk, bk, wv, bv, wo, bo, gamma, beta = params
    H = wq.shape[0]
    assert H % num_heads == 0
    inv_sqrt_d = 1.0 / math.sqrt(H // num_heads)
    wqkv = jnp.concatenate([wq * inv_sqrt_d, wk, wv], axis=1).astype(jnp.bfloat16)
    bqkv = jnp.concatenate([bq * inv_sqrt_d, bk, bv], axis=1).astype(jnp.float32)
    return (wqkv, bqkv, wo.astype(jnp.bfloat16), bo.astype(jnp.float32),
            gamma.astype(jnp.float32), beta.astype(jnp.float32))


def bert_attention(hidden_states, attention_mask, packed_params, *, num_heads,
                   eps=1e-12, q_tile=None, vmem_limit_bytes=None):
    """hidden_states: (B, S, H) f32; attention_mask: additive, (B, 1, 1, S) or None.

    packed_params: output of pack_params().
    """
    B, S, H = hidden_states.shape
    assert H % num_heads == 0
    head_dim = H // num_heads

    if q_tile is None:
        q_tile = S if S <= 512 else 256       # multiples of 8 (128 preferred)
    assert S % q_tile == 0
    nq = S // q_tile

    if attention_mask is None:
        mask = jnp.zeros((B, 1, S), dtype=jnp.float32)
    else:
        mask = attention_mask.reshape(B, 1, S).astype(jnp.float32)

    wqkv, bqkv, wo16, bo, gamma, beta = packed_params

    if vmem_limit_bytes is None:
        vmem_limit_bytes = _default_vmem_limit_bytes()

    kernel = partial(
        _bert_attention_kernel,
        num_heads=num_heads, head_dim=head_dim, hidden=H,
        seq_len=S, q_tile=q_tile, eps=eps,
    )

    return pl.pallas_call(
        kernel,
        out_shape=jax.ShapeDtypeStruct((B, S, H), jnp.float32),
        grid_spec=pltpu.PrefetchScalarGridSpec(
            num_scalar_prefetch=0,
            grid=(B, nq),
            in_specs=[
                # hidden_states: full sequence per batch; block index depends only
                # on b, so it is DMA'd once per batch and stays resident over qi.
                pl.BlockSpec((1, S, H), lambda b, qi: (b, 0, 0)),
                pl.BlockSpec((1, 1, S), lambda b, qi: (b, 0, 0)),   # additive mask
                _const_spec((H, 3 * H)),                            # packed QKV weight (bf16)
                _const_spec((1, 3 * H)),                            # packed QKV bias
                _const_spec((H, H)),                                # output.dense weight (bf16)
                _const_spec((1, H)),                                # output.dense bias
                _const_spec((1, H)),                                # LayerNorm gamma
                _const_spec((1, H)),                                # LayerNorm beta
            ],
            out_specs=pl.BlockSpec((1, q_tile, H), lambda b, qi: (b, qi, 0)),
            scratch_shapes=[
                pltpu.VMEM((S, H), jnp.bfloat16),        # cached K (per batch)
                pltpu.VMEM((S, H), jnp.bfloat16),        # cached V (per batch)
                pltpu.VMEM((q_tile, H), jnp.bfloat16),   # per-head context assembly
            ],
        ),
        compiler_params=pltpu.CompilerParams(
            # qi axis is "arbitrary": the K/V scratch cache is carried across it.
            dimension_semantics=("parallel", "arbitrary"),
            vmem_limit_bytes=vmem_limit_bytes,
        ),
    )(hidden_states, mask, wqkv, bqkv, wo16, bo, gamma, beta)


def init_params(key, hidden_size):
    """Deterministic synthetic weights. Linear weights stored (in, out)."""
    keys = jax.random.split(key, 8)
    H = hidden_size
    scale = 0.02
    wq = scale * jax.random.normal(keys[0], (H, H), jnp.float32)
    bq = scale * jax.random.normal(keys[1], (1, H), jnp.float32)
    wk = scale * jax.random.normal(keys[2], (H, H), jnp.float32)
    bk = scale * jax.random.normal(keys[3], (1, H), jnp.float32)
    wv = scale * jax.random.normal(keys[4], (H, H), jnp.float32)
    bv = scale * jax.random.normal(keys[5], (1, H), jnp.float32)
    wo = scale * jax.random.normal(keys[6], (H, H), jnp.float32)
    bo = scale * jax.random.normal(keys[7], (1, H), jnp.float32)
    gamma = jnp.ones((1, H), jnp.float32)
    beta = jnp.zeros((1, H), jnp.float32)
    return (wq, bq, wk, bk, wv, bv, wo, bo, gamma, beta)


if __name__ == "__main__":
    # Small BERT-like config: batch=2, seq=16, hidden=32, heads=4 (head_dim=8).
    B, S, H, NH = 2, 16, 32, 4

    key = jax.random.PRNGKey(0)
    k_x, k_p = jax.random.split(key)

    hidden_states = jax.random.normal(k_x, (B, S, H), jnp.float32)
    # HF-style additive attention mask: 0 for attend, -10000 for masked positions.
    valid = jnp.array([[1.0] * S, [1.0] * (S - 2) + [0.0, 0.0]], dtype=jnp.float32)
    attention_mask = (1.0 - valid).reshape(B, 1, 1, S) * -10000.0

    params = init_params(k_p, H)
    packed = pack_params(params, num_heads=NH)   # one-time packing (bf16, QKV concat, scale folded)

    # Path 1: single query tile -> fused (S,H)x(H,3H) QKV projection.
    out_fused = bert_attention(hidden_states, attention_mask, packed, num_heads=NH)
    # Path 2: query-tiled -> K/V computed once per batch and cached in VMEM scratch.
    out_tiled = bert_attention(hidden_states, attention_mask, packed, num_heads=NH, q_tile=8)
    jax.block_until_ready((out_fused, out_tiled))

    assert out_fused.shape == (B, S, H)
    assert out_tiled.shape == (B, S, H)
    # Both code paths implement the same math; allow bf16-level tolerance.
    assert jnp.allclose(out_fused, out_tiled, atol=5e-2, rtol=5e-2)
    print("KERNEL_OK")
</pallas_src>

<mosaic_0001>
module attributes {stable_mosaic.version = 11 : i64} {
  func.func @_bert_attention_kernel(%arg0: i32, %arg1: i32, %arg2: memref<1x16x32xf32, #tpu.memory_space<vmem>>, %arg3: memref<1x1x16xf32, #tpu.memory_space<vmem>>, %arg4: memref<32x96xbf16, #tpu.memory_space<vmem>>, %arg5: memref<1x96xf32, #tpu.memory_space<vmem>>, %arg6: memref<32x32xbf16, #tpu.memory_space<vmem>>, %arg7: memref<1x32xf32, #tpu.memory_space<vmem>>, %arg8: memref<1x32xf32, #tpu.memory_space<vmem>>, %arg9: memref<1x32xf32, #tpu.memory_space<vmem>>, %arg10: memref<1x16x32xf32, #tpu.memory_space<vmem>>, %arg11: memref<16x32xbf16, #tpu.memory_space<vmem>>, %arg12: memref<16x32xbf16, #tpu.memory_space<vmem>>, %arg13: memref<16x32xbf16, #tpu.memory_space<vmem>>) attributes {dimension_semantics = [#tpu.dimension_semantics<parallel>, #tpu.dimension_semantics<arbitrary>], iteration_bounds = array<i64: 2, 1>, scalar_prefetch = 0 : i64, scratch_operands = 3 : i64, tpu.core_type = #tpu.core_type<tc>, window_params = [{transform_indices = @transform_0, window_bounds = array<i64: 1, 16, 32>}, {transform_indices = @transform_1, window_bounds = array<i64: 1, 1, 16>}, {pipeline_mode = #tpu.pipeline_mode<synchronous>, transform_indices = @transform_2, window_bounds = array<i64: 32, 96>}, {pipeline_mode = #tpu.pipeline_mode<synchronous>, transform_indices = @transform_3, window_bounds = array<i64: 1, 96>}, {pipeline_mode = #tpu.pipeline_mode<synchronous>, transform_indices = @transform_4, window_bounds = array<i64: 32, 32>}, {pipeline_mode = #tpu.pipeline_mode<synchronous>, transform_indices = @transform_5, window_bounds = array<i64: 1, 32>}, {pipeline_mode = #tpu.pipeline_mode<synchronous>, transform_indices = @transform_6, window_bounds = array<i64: 1, 32>}, {pipeline_mode = #tpu.pipeline_mode<synchronous>, transform_indices = @transform_7, window_bounds = array<i64: 1, 32>}, {transform_indices = @transform_8, window_bounds = array<i64: 1, 16, 32>}]} {
    %c0 = arith.constant 0 : index
    %c0_0 = arith.constant 0 : index
    %c0_1 = arith.constant 0 : index
    %0 = vector.load %arg2[%c0, %c0_0, %c0_1] : memref<1x16x32xf32, #tpu.memory_space<vmem>>, vector<1x16x32xf32>
    %1 = vector.shape_cast %0 : vector<1x16x32xf32> to vector<16x32xf32>
    %2 = arith.truncf %1 : vector<16x32xf32> to vector<16x32xbf16>
    %c0_2 = arith.constant 0 : index
    %c0_3 = arith.constant 0 : index
    %3 = vector.load %arg4[%c0_2, %c0_3] : memref<32x96xbf16, #tpu.memory_space<vmem>>, vector<32x96xbf16>
    %cst = arith.constant dense<0.000000e+00> : vector<16x96xf32>
    %4 = tpu.matmul %2, %3, %cst {dimension_numbers = #tpu.dot_dimension_numbers<[1], [0], [0], [1], [0, 0, 1, 1], [], []>} : vector<16x32xbf16>, vector<32x96xbf16>, vector<16x96xf32> -> vector<16x96xf32>
    %c0_4 = arith.constant 0 : index
    %c0_5 = arith.constant 0 : index
    %5 = vector.load %arg5[%c0_4, %c0_5] : memref<1x96xf32, #tpu.memory_space<vmem>>, vector<1x96xf32>
    %6 = vector.broadcast %5 : vector<1x96xf32> to vector<16x96xf32>
    %7 = arith.addf %4, %6 : vector<16x96xf32>
    %8 = vector.extract_strided_slice %7 {offsets = [0, 0], sizes = [16, 32], strides = [1, 1]} : vector<16x96xf32> to vector<16x32xf32>
    %9 = arith.truncf %8 : vector<16x32xf32> to vector<16x32xbf16>
    %10 = vector.extract_strided_slice %7 {offsets = [0, 32], sizes = [16, 32], strides = [1, 1]} : vector<16x96xf32> to vector<16x32xf32>
    %11 = arith.truncf %10 : vector<16x32xf32> to vector<16x32xbf16>
    %12 = vector.extract_strided_slice %7 {offsets = [0, 64], sizes = [16, 32], strides = [1, 1]} : vector<16x96xf32> to vector<16x32xf32>
    %13 = arith.truncf %12 : vector<16x32xf32> to vector<16x32xbf16>
    %c0_6 = arith.constant 0 : index
    %c0_7 = arith.constant 0 : index
    %c0_8 = arith.constant 0 : index
    %14 = vector.load %arg3[%c0_6, %c0_7, %c0_8] : memref<1x1x16xf32, #tpu.memory_space<vmem>>, vector<1x1x16xf32>
    %15 = vector.shape_cast %14 : vector<1x1x16xf32> to vector<1x16xf32>
    %16 = vector.shape_cast %15 : vector<1x16xf32> to vector<1x16xf32>
    %17 = vector.broadcast %16 : vector<1x16xf32> to vector<16x16xf32>
    %18 = vector.extract_strided_slice %9 {offsets = [0, 0], sizes = [16, 8], strides = [1, 1]} : vector<16x32xbf16> to vector<16x8xbf16>
    %19 = vector.extract_strided_slice %11 {offsets = [0, 0], sizes = [16, 8], strides = [1, 1]} : vector<16x32xbf16> to vector<16x8xbf16>
    %20 = vector.extract_strided_slice %13 {offsets = [0, 0], sizes = [16, 8], strides = [1, 1]} : vector<16x32xbf16> to vector<16x8xbf16>
    %cst_9 = arith.constant dense<0.000000e+00> : vector<16x16xf32>
    %21 = tpu.matmul %18, %19, %cst_9 {dimension_numbers = #tpu.dot_dimension_numbers<[1], [1], [0], [0], [0, 0, 1, 0], [], []>} : vector<16x8xbf16>, vector<16x8xbf16>, vector<16x16xf32> -> vector<16x16xf32>
    %22 = arith.addf %21, %17 : vector<16x16xf32>
    %cst_10 = arith.constant dense<0xFF800000> : vector<16xf32>
    %23 = vector.multi_reduction <maximumf>, %22, %cst_10 [1] : vector<16x16xf32> to vector<16xf32>
    %24 = vector.shape_cast %23 : vector<16xf32> to vector<16x1xf32>
    %25 = vector.broadcast %24 : vector<16x1xf32> to vector<16x16xf32>
    %26 = arith.subf %22, %25 : vector<16x16xf32>
    %27 = math.exp %26 : vector<16x16xf32>
    %cst_11 = arith.constant dense<0.000000e+00> : vector<16xf32>
    %28 = vector.multi_reduction <add>, %27, %cst_11 [1] : vector<16x16xf32> to vector<16xf32>
    %29 = vector.shape_cast %28 : vector<16xf32> to vector<16x1xf32>
    %30 = tpu.reciprocal %29 {approx = true} : vector<16x1xf32> -> vector<16x1xf32>
    %31 = vector.broadcast %30 : vector<16x1xf32> to vector<16x16xf32>
    %32 = arith.mulf %27, %31 : vector<16x16xf32>
    %33 = arith.truncf %32 : vector<16x16xf32> to vector<16x16xbf16>
    %cst_12 = arith.constant dense<0.000000e+00> : vector<16x8xf32>
    %34 = tpu.matmul %33, %20, %cst_12 {dimension_numbers = #tpu.dot_dimension_numbers<[1], [0], [0], [1], [0, 0, 1, 1], [], []>} : vector<16x16xbf16>, vector<16x8xbf16>, vector<16x8xf32> -> vector<16x8xf32>
    %35 = arith.truncf %34 : vector<16x8xf32> to vector<16x8xbf16>
    %c0_13 = arith.constant 0 : index
    %c0_14 = arith.constant 0 : index
    %36 = vector.load %arg13[%c0_13, %c0_14] : memref<16x32xbf16, #tpu.memory_space<vmem>>, vector<16x8xbf16>
    tpu.vector_store %arg13[%c0_13, %c0_14], %35 {strides = array<i32>} : memref<16x32xbf16, #tpu.memory_space<vmem>>, vector<16x8xbf16>,
    %37 = vector.extract_strided_slice %9 {offsets = [0, 8], sizes = [16, 8], strides = [1, 1]} : vector<16x32xbf16> to vector<16x8xbf16>
    %38 = vector.extract_strided_slice %11 {offsets = [0, 8], sizes = [16, 8], strides = [1, 1]} : vector<16x32xbf16> to vector<16x8xbf16>
    %39 = vector.extract_strided_slice %13 {offsets = [0, 8], sizes = [16, 8], strides = [1, 1]} : vector<16x32xbf16> to vector<16x8xbf16>
    %cst_15 = arith.constant dense<0.000000e+00> : vector<16x16xf32>
    %40 = tpu.matmul %37, %38, %cst_15 {dimension_numbers = #tpu.dot_dimension_numbers<[1], [1], [0], [0], [0, 0, 1, 0], [], []>} : vector<16x8xbf16>, vector<16x8xbf16>, vector<16x16xf32> -> vector<16x16xf32>
    %41 = arith.addf %40, %17 : vector<16x16xf32>
    %cst_16 = arith.constant dense<0xFF800000> : vector<16xf32>
    %42 = vector.multi_reduction <maximumf>, %41, %cst_16 [1] : vector<16x16xf32> to vector<16xf32>
    %43 = vector.shape_cast %42 : vector<16xf32> to vector<16x1xf32>
    %44 = vector.broadcast %43 : vector<16x1xf32> to vector<16x16xf32>
    %45 = arith.subf %41, %44 : vector<16x16xf32>
    %46 = math.exp %45 : vector<16x16xf32>
    %cst_17 = arith.constant dense<0.000000e+00> : vector<16xf32>
    %47 = vector.multi_reduction <add>, %46, %cst_17 [1] : vector<16x16xf32> to vector<16xf32>
    %48 = vector.shape_cast %47 : vector<16xf32> to vector<16x1xf32>
    %49 = tpu.reciprocal %48 {approx = true} : vector<16x1xf32> -> vector<16x1xf32>
    %50 = vector.broadcast %49 : vector<16x1xf32> to vector<16x16xf32>
    %51 = arith.mulf %46, %50 : vector<16x16xf32>
    %52 = arith.truncf %51 : vector<16x16xf32> to vector<16x16xbf16>
    %cst_18 = arith.constant dense<0.000000e+00> : vector<16x8xf32>
    %53 = tpu.matmul %52, %39, %cst_18 {dimension_numbers = #tpu.dot_dimension_numbers<[1], [0], [0], [1], [0, 0, 1, 1], [], []>} : vector<16x16xbf16>, vector<16x8xbf16>, vector<16x8xf32> -> vector<16x8xf32>
    %54 = arith.truncf %53 : vector<16x8xf32> to vector<16x8xbf16>
    %c0_19 = arith.constant 0 : index
    %c8 = arith.constant 8 : index
    %55 = vector.load %arg13[%c0_19, %c8] : memref<16x32xbf16, #tpu.memory_space<vmem>>, vector<16x8xbf16>
    tpu.vector_store %arg13[%c0_19, %c8], %54 {strides = array<i32>} : memref<16x32xbf16, #tpu.memory_space<vmem>>, vector<16x8xbf16>,
    %56 = vector.extract_strided_slice %9 {offsets = [0, 16], sizes = [16, 8], strides = [1, 1]} : vector<16x32xbf16> to vector<16x8xbf16>
    %57 = vector.extract_strided_slice %11 {offsets = [0, 16], sizes = [16, 8], strides = [1, 1]} : vector<16x32xbf16> to vector<16x8xbf16>
    %58 = vector.extract_strided_slice %13 {offsets = [0, 16], sizes = [16, 8], strides = [1, 1]} : vector<16x32xbf16> to vector<16x8xbf16>
    %cst_20 = arith.constant dense<0.000000e+00> : vector<16x16xf32>
    %59 = tpu.matmul %56, %57, %cst_20 {dimension_numbers = #tpu.dot_dimension_numbers<[1], [1], [0], [0], [0, 0, 1, 0], [], []>} : vector<16x8xbf16>, vector<16x8xbf16>, vector<16x16xf32> -> vector<16x16xf32>
    %60 = arith.addf %59, %17 : vector<16x16xf32>
    %cst_21 = arith.constant dense<0xFF800000> : vector<16xf32>
    %61 = vector.multi_reduction <maximumf>, %60, %cst_21 [1] : vector<16x16xf32> to vector<16xf32>
    %62 = vector.shape_cast %61 : vector<16xf32> to vector<16x1xf32>
    %63 = vector.broadcast %62 : vector<16x1xf32> to vector<16x16xf32>
    %64 = arith.subf %60, %63 : vector<16x16xf32>
    %65 = math.exp %64 : vector<16x16xf32>
    %cst_22 = arith.constant dense<0.000000e+00> : vector<16xf32>
    %66 = vector.multi_reduction <add>, %65, %cst_22 [1] : vector<16x16xf32> to vector<16xf32>
    %67 = vector.shape_cast %66 : vector<16xf32> to vector<16x1xf32>
    %68 = tpu.reciprocal %67 {approx = true} : vector<16x1xf32> -> vector<16x1xf32>
    %69 = vector.broadcast %68 : vector<16x1xf32> to vector<16x16xf32>
    %70 = arith.mulf %65, %69 : vector<16x16xf32>
    %71 = arith.truncf %70 : vector<16x16xf32> to vector<16x16xbf16>
    %cst_23 = arith.constant dense<0.000000e+00> : vector<16x8xf32>
    %72 = tpu.matmul %71, %58, %cst_23 {dimension_numbers = #tpu.dot_dimension_numbers<[1], [0], [0], [1], [0, 0, 1, 1], [], []>} : vector<16x16xbf16>, vector<16x8xbf16>, vector<16x8xf32> -> vector<16x8xf32>
    %73 = arith.truncf %72 : vector<16x8xf32> to vector<16x8xbf16>
    %c0_24 = arith.constant 0 : index
    %c16 = arith.constant 16 : index
    %74 = vector.load %arg13[%c0_24, %c16] : memref<16x32xbf16, #tpu.memory_space<vmem>>, vector<16x8xbf16>
    tpu.vector_store %arg13[%c0_24, %c16], %73 {strides = array<i32>} : memref<16x32xbf16, #tpu.memory_space<vmem>>, vector<16x8xbf16>,
    %75 = vector.extract_strided_slice %9 {offsets = [0, 24], sizes = [16, 8], strides = [1, 1]} : vector<16x32xbf16> to vector<16x8xbf16>
    %76 = vector.extract_strided_slice %11 {offsets = [0, 24], sizes = [16, 8], strides = [1, 1]} : vector<16x32xbf16> to vector<16x8xbf16>
    %77 = vector.extract_strided_slice %13 {offsets = [0, 24], sizes = [16, 8], strides = [1, 1]} : vector<16x32xbf16> to vector<16x8xbf16>
    %cst_25 = arith.constant dense<0.000000e+00> : vector<16x16xf32>
    %78 = tpu.matmul %75, %76, %cst_25 {dimension_numbers = #tpu.dot_dimension_numbers<[1], [1], [0], [0], [0, 0, 1, 0], [], []>} : vector<16x8xbf16>, vector<16x8xbf16>, vector<16x16xf32> -> vector<16x16xf32>
    %79 = arith.addf %78, %17 : vector<16x16xf32>
    %cst_26 = arith.constant dense<0xFF800000> : vector<16xf32>
    %80 = vector.multi_reduction <maximumf>, %79, %cst_26 [1] : vector<16x16xf32> to vector<16xf32>
    %81 = vector.shape_cast %80 : vector<16xf32> to vector<16x1xf32>
    %82 = vector.broadcast %81 : vector<16x1xf32> to vector<16x16xf32>
    %83 = arith.subf %79, %82 : vector<16x16xf32>
    %84 = math.exp %83 : vector<16x16xf32>
    %cst_27 = arith.constant dense<0.000000e+00> : vector<16xf32>
    %85 = vector.multi_reduction <add>, %84, %cst_27 [1] : vector<16x16xf32> to vector<16xf32>
    %86 = vector.shape_cast %85 : vector<16xf32> to vector<16x1xf32>
    %87 = tpu.reciprocal %86 {approx = true} : vector<16x1xf32> -> vector<16x1xf32>
    %88 = vector.broadcast %87 : vector<16x1xf32> to vector<16x16xf32>
    %89 = arith.mulf %84, %88 : vector<16x16xf32>
    %90 = arith.truncf %89 : vector<16x16xf32> to vector<16x16xbf16>
    %cst_28 = arith.constant dense<0.000000e+00> : vector<16x8xf32>
    %91 = tpu.matmul %90, %77, %cst_28 {dimension_numbers = #tpu.dot_dimension_numbers<[1], [0], [0], [1], [0, 0, 1, 1], [], []>} : vector<16x16xbf16>, vector<16x8xbf16>, vector<16x8xf32> -> vector<16x8xf32>
    %92 = arith.truncf %91 : vector<16x8xf32> to vector<16x8xbf16>
    %c0_29 = arith.constant 0 : index
    %c24 = arith.constant 24 : index
    %93 = vector.load %arg13[%c0_29, %c24] : memref<16x32xbf16, #tpu.memory_space<vmem>>, vector<16x8xbf16>
    tpu.vector_store %arg13[%c0_29, %c24], %92 {strides = array<i32>} : memref<16x32xbf16, #tpu.memory_space<vmem>>, vector<16x8xbf16>,
    %c0_30 = arith.constant 0 : index
    %c0_31 = arith.constant 0 : index
    %94 = vector.load %arg13[%c0_30, %c0_31] : memref<16x32xbf16, #tpu.memory_space<vmem>>, vector<16x32xbf16>
    %c0_32 = arith.constant 0 : index
    %c0_33 = arith.constant 0 : index
    %95 = vector.load %arg6[%c0_32, %c0_33] : memref<32x32xbf16, #tpu.memory_space<vmem>>, vector<32x32xbf16>
    %cst_34 = arith.constant dense<0.000000e+00> : vector<16x32xf32>
    %96 = tpu.matmul %94, %95, %cst_34 {dimension_numbers = #tpu.dot_dimension_numbers<[1], [0], [0], [1], [0, 0, 1, 1], [], []>} : vector<16x32xbf16>, vector<32x32xbf16>, vector<16x32xf32> -> vector<16x32xf32>
    %c0_35 = arith.constant 0 : index
    %c0_36 = arith.constant 0 : index
    %97 = vector.load %arg7[%c0_35, %c0_36] : memref<1x32xf32, #tpu.memory_space<vmem>>, vector<1x32xf32>
    %98 = vector.broadcast %97 : vector<1x32xf32> to vector<16x32xf32>
    %99 = arith.addf %96, %98 : vector<16x32xf32>
    %100 = arith.addf %99, %1 : vector<16x32xf32>
    %cst_37 = arith.constant dense<0.000000e+00> : vector<16xf32>
    %101 = vector.multi_reduction <add>, %100, %cst_37 [1] : vector<16x32xf32> to vector<16xf32>
    %102 = vector.shape_cast %101 : vector<16xf32> to vector<16x1xf32>
    %cst_38 = arith.constant 3.200000e+01 : f32
    %103 = vector.broadcast %cst_38 : f32 to vector<16x1xf32>
    %104 = arith.divf %102, %103 : vector<16x1xf32>
    %105 = vector.broadcast %104 : vector<16x1xf32> to vector<16x32xf32>
    %106 = arith.subf %100, %105 : vector<16x32xf32>
    %107 = arith.mulf %106, %106 : vector<16x32xf32>
    %cst_39 = arith.constant dense<0.000000e+00> : vector<16xf32>
    %108 = vector.multi_reduction <add>, %107, %cst_39 [1] : vector<16x32xf32> to vector<16xf32>
    %109 = vector.shape_cast %108 : vector<16xf32> to vector<16x1xf32>
    %cst_40 = arith.constant 3.200000e+01 : f32
    %110 = vector.broadcast %cst_40 : f32 to vector<16x1xf32>
    %111 = arith.divf %109, %110 : vector<16x1xf32>
    %112 = vector.broadcast %104 : vector<16x1xf32> to vector<16x32xf32>
    %113 = arith.subf %100, %112 : vector<16x32xf32>
    %cst_41 = arith.constant 9.99999996E-13 : f32
    %114 = vector.broadcast %cst_41 : f32 to vector<16x1xf32>
    %115 = arith.addf %111, %114 : vector<16x1xf32>
    %116 = math.rsqrt %115 : vector<16x1xf32>
    %117 = vector.broadcast %116 : vector<16x1xf32> to vector<16x32xf32>
    %118 = arith.mulf %113, %117 : vector<16x32xf32>
    %c0_42 = arith.constant 0 : index
    %c0_43 = arith.constant 0 : index
    %119 = vector.load %arg8[%c0_42, %c0_43] : memref<1x32xf32, #tpu.memory_space<vmem>>, vector<1x32xf32>
    %120 = vector.broadcast %119 : vector<1x32xf32> to vector<16x32xf32>
    %121 = arith.mulf %118, %120 : vector<16x32xf32>
    %c0_44 = arith.constant 0 : index
    %c0_45 = arith.constant 0 : index
    %122 = vector.load %arg9[%c0_44, %c0_45] : memref<1x32xf32, #tpu.memory_space<vmem>>, vector<1x32xf32>
    %123 = vector.broadcast %122 : vector<1x32xf32> to vector<16x32xf32>
    %124 = arith.addf %121, %123 : vector<16x32xf32>
    %c0_46 = arith.constant 0 : index
    %c0_47 = arith.constant 0 : index
    %c0_48 = arith.constant 0 : index
    %125 = vector.load %arg10[%c0_46, %c0_47, %c0_48] : memref<1x16x32xf32, #tpu.memory_space<vmem>>, vector<1x16x32xf32>
    %126 = vector.shape_cast %125 : vector<1x16x32xf32> to vector<16x32xf32>
    %127 = vector.shape_cast %124 : vector<16x32xf32> to vector<1x16x32xf32>
    tpu.vector_store %arg10[%c0_46, %c0_47, %c0_48], %127 {strides = array<i32>} : memref<1x16x32xf32, #tpu.memory_space<vmem>>, vector<1x16x32xf32>,
    return
  }
  func.func @transform_0(%arg0: i32, %arg1: i32) -> (i32, i32, i32) {
    %c0_i32 = arith.constant 0 : i32
    %c0_i32_0 = arith.constant 0 : i32
    %c0_i32_1 = arith.constant 0 : i32
    return %arg0, %c0_i32, %c0_i32_0 : i32, i32, i32
  }
  func.func @transform_1(%arg0: i32, %arg1: i32) -> (i32, i32, i32) {
    %c0_i32 = arith.constant 0 : i32
    %c0_i32_0 = arith.constant 0 : i32
    %c0_i32_1 = arith.constant 0 : i32
    return %arg0, %c0_i32, %c0_i32_0 : i32, i32, i32
  }
  func.func @transform_2(%arg0: i32, %arg1: i32) -> (i32, i32) {
    %c0_i32 = arith.constant 0 : i32
    %c0_i32_0 = arith.constant 0 : i32
    %c0_i32_1 = arith.constant 0 : i32
    return %c0_i32, %c0_i32_0 : i32, i32
  }
  func.func @transform_3(%arg0: i32, %arg1: i32) -> (i32, i32) {
    %c0_i32 = arith.constant 0 : i32
    %c0_i32_0 = arith.constant 0 : i32
    %c0_i32_1 = arith.constant 0 : i32
    return %c0_i32, %c0_i32_0 : i32, i32
  }
  func.func @transform_4(%arg0: i32, %arg1: i32) -> (i32, i32) {
    %c0_i32 = arith.constant 0 : i32
    %c0_i32_0 = arith.constant 0 : i32
    %c0_i32_1 = arith.constant 0 : i32
    return %c0_i32, %c0_i32_0 : i32, i32
  }
  func.func @transform_5(%arg0: i32, %arg1: i32) -> (i32, i32) {
    %c0_i32 = arith.constant 0 : i32
    %c0_i32_0 = arith.constant 0 : i32
    %c0_i32_1 = arith.constant 0 : i32
    return %c0_i32, %c0_i32_0 : i32, i32
  }
  func.func @transform_6(%arg0: i32, %arg1: i32) -> (i32, i32) {
    %c0_i32 = arith.constant 0 : i32
    %c0_i32_0 = arith.constant 0 : i32
    %c0_i32_1 = arith.constant 0 : i32
    return %c0_i32, %c0_i32_0 : i32, i32
  }
  func.func @transform_7(%arg0: i32, %arg1: i32) -> (i32, i32) {
    %c0_i32 = arith.constant 0 : i32
    %c0_i32_0 = arith.constant 0 : i32
    %c0_i32_1 = arith.constant 0 : i32
    return %c0_i32, %c0_i32_0 : i32, i32
  }
  func.func @transform_8(%arg0: i32, %arg1: i32) -> (i32, i32, i32) {
    %c0_i32 = arith.constant 0 : i32
    %c0_i32_0 = arith.constant 0 : i32
    return %arg0, %arg1, %c0_i32 : i32, i32, i32
  }
}

</mosaic_0001>

<bundles_post_ra>
// kernel: tpu_custom_call.1
= control target key start
LH: loop header
LB: loop body
LE: loop exit
PB: predicated region body
PF: predicated region fallthrough
CT: control target
= control target key end

     0   :  { %s1771_s0 = inlined_call_operand.hbm [shape: f32[2,16,32], index: 0, kind: input, shape index: {}]   ;;  %s1772_s1 = inlined_call_operand.hbm [shape: f32[2,1,16], index: 1, kind: input, shape index: {}]   ;;  %s1773_s2 = inlined_call_operand.hbm [shape: bf16[32,96], index: 2, kind: input, shape index: {}]   ;;  %s1774_s3 = inlined_call_operand.vmem [shape: f32[1,96], index: 3, kind: input, shape index: {}]   ;;  %s1775_s4 = inlined_call_operand.hbm [shape: bf16[32,32], index: 4, kind: input, shape index: {}]   ;;  %s1776_s5 = inlined_call_operand.vmem [shape: f32[1,32], index: 5, kind: input, shape index: {}]   ;;  %s1777_s6 = inlined_call_operand.vmem [shape: f32[1,32], index: 6, kind: input, shape index: {}]   ;;  %s1778_s7 = inlined_call_operand.vmem [shape: f32[1,32], index: 7, kind: input, shape index: {}]   ;;  %s1779_s8 = inlined_call_operand.hbm [shape: f32[2,16,32], index: 8, kind: output, shape index: {}]  }
   0x1   :  { %1787 = sst [smem:[#allocation25_spill]] %s1773_s2 }
   0x2   :  { %1788 = sst [smem:[#allocation26_spill]] %s1775_s4 }
   0x3   :  { %1789 = sst [smem:[#allocation27_spill]] %s1779_s8 }
   0x4   :  { %13 = vsyncpa [#allocation6], 0 }
   0x5   :  { %15 = vsyncpa [#allocation6 + $0x1], 0 }
   0x6   :  { %16 = vsyncpa [#allocation9], 0 }
   0x7   :  { %18 = vsyncpa [#allocation9 + $0x1], 0 }
   0x8   :  { %19 = vsyncpa [#allocation12], 0 }
   0x9   :  { %20 = vsyncpa [#allocation7], 0 }
   0xa   :  { %22 = vsyncpa [#allocation7 + $0x1], 0  ;;  %s1515_s27 = smov 0   ;;  %s1517_s28 = smov 0  }
   0xb   :  { %s1519_s29 = smov 0   ;;  %s1521_s30 = smov 0  }
   0xc   :  { %s1523_s9 = smov 0   ;;  %s1525_s10 = smov 0  }
   0xd LB: > { %1790 = sst [smem:[#allocation19_spill]] %s1426_s27  ;;  %s1546_s11 = sadd.s32 4294967295, %s1446_s10   ;;  %s1446_s10 = sphi %s1525_s10, %s28_s10   ;;  %s1442_s9 = sphi %s1523_s9, %s1813_s9   ;;  %s1438_s30 = sphi %s1521_s30, %s1812_s30   ;;  %s1434_s29 = sphi %s1519_s29, %s1808_s29   ;;  %s1430_s28 = sphi %s1517_s28, %s1811_s28   ;;  %s1426_s27 = sphi %s1515_s27, %s1810_s27  }
   0xe   : > { %1791 = sst [smem:[#allocation20_spill]] %s1434_s29  ;;  %s1026_s12 = sadd.s32 4294967294, %s1446_s10  }
   0xf   : > { %p60_p0 = scmp.ne.s32.totalorder %s1430_s28, %s1426_s27  ;;  %p61_p1 = scmp.eq.s32.totalorder %s1546_s11, 0 }
  0x10   : > { %p238_p2 = scmp.eq.s32.totalorder %s1546_s11, 1  ;;  %p244_p3 = scmp.eq.s32.totalorder %s1026_s12, 1 }
  0x11   : > { %p1555_p4 = por %p61_p1, %p60_p0  ;;  %p1027_p5 = scmp.ge.s32.totalorder %s1446_s10, 1 }
  0x12   : > { %p1560_p6 = por %p244_p3, %p60_p0  ;;  %p251_p7 = scmp.lt.s32.totalorder %s1446_s10, 3 }
  0x13   : > { %s1795_s2 = sld [smem:[#allocation25_spill]]  ;;  %s1448_s19 = smov [#allocation10]  }
  0x14   : > { %s1793_s14 = scalar_select %p1560_p6, 1, 0 }
  0x15   : > { %p1568_p8 = pnand %p1027_p5, %p251_p7  ;;  %s264_s20 = sshll.u32 %s1448_s19, 4  ;;  %s265_s20 = int_to_ptr.vmem [resolvable:$true] %s264_s20 }
  0x16   : > { %1794 = sst [smem:[#allocation21_spill]] %s1793_s14  ;;  %p1030_p11 = scmp.ge.s32.totalorder %s1446_s10, 2 }
  0x17   : > { %p1095_p9 = pneg %p1568_p8  ;;  %s1797_s4 = sld [smem:[#allocation26_spill]] }
  0x18   : > { %s1449_s24 = smov 64   ;;  %s1450_s25 = smov 4  }
  0x19   : > { %s262_s17 = sshll.u32 %s1795_s2, 4  ;;  %p1096_p10 = pnand %p1095_p9, %p61_p1  ;;  %s263_s17 = int_to_ptr.hbm [resolvable:$true] %s262_s17 }
  0x1a   : > { %s1451_s26 = smov [#allocation11]   ;;  %s40_s15 = sadd.s32 1, %s1442_s9 }
  0x1b   : > { %1098 = dma.hbm_to_vmem [thread:$0]  (!%p1096_p10), %s263_s17, 256, %s265_s20, [#allocation9], %s1449_s24, %s1449_s24, %s1450_s25  }
  0x1c   : > { %s281_s12 = sshll.u32 %s1451_s26, 4  ;;  %s47_s16 = sadd.s32 1, %s1434_s29  ;;  %s282_s12 = int_to_ptr.vmem [resolvable:$true] %s281_s12 }
  0x1d   : > { %s279_s23 = sshll.u32 %s1797_s4, 4  ;;  %p42_p12 = scmp.ge.s32.totalorder %s40_s15, 2  ;;  %s280_s23 = int_to_ptr.hbm [resolvable:$true] %s279_s23 }
  0x1e   : > { %1101 = dma.hbm_to_vmem [thread:$0]  (!%p1096_p10), %s280_s23, 256, %s282_s12, [#allocation12], %s1449_s24, %s1449_s24, %s1450_s25  }
  0x1f   : > { %p54_p13 = scmp.ne.s32.totalorder %s1434_s29, %s1430_s28  ;;  %p55_p0 = scmp.eq.s32.totalorder %s1446_s10, 0 }
  0x20   : > { %p1115_p3 = scmp.lt.s32.totalorder %s1446_s10, 2  ;;  %s1815_s15 = smov (%p42_p12, %s40_s15), 0 }
  0x21   : > { %1798 = sst [smem:[#allocation22_spill]] %s1815_s15  ;;  %p1588_p5 = por %p55_p0, %p54_p13 }
  0x22   : > { %p1594_p7 = por %p238_p2, %p54_p13  ;;  %s44_s20 = ssub.s32 %s1442_s9, %s1815_s15 }
  0x23   : > { %s304_s21 = sand.u32 1, %s1434_s29   ;;  %p45_p9 = scmp.eq.s32.totalorder %s44_s20, 0 }
  0x24   : > { %s1800_s17 = scalar_select %p1594_p7, 1, 0 }
  0x25   : > { %s1031_s22 = sshll.u32 %s304_s21, 4  ;;  %s1074_s23 = sshll.u32 %s1442_s9, 4 }
  0x26   : > { %1801 = sst [smem:[#allocation23_spill]] %s1800_s17  ;;  %s313_s12 = scalar_lea.hbm %s1771_s0, %s1074_s23 }
  0x27   : > { %s1603_s24 = scalar_select %p45_p9, %s1434_s29, %s47_s16  }
  0x28   : > { %s314_s2 = sshll.u32 %s313_s12, 4  ;;  %s308_s4 = scalar_lea.vmem [#allocation5], %s1031_s22  ;;  %s315_s2 = int_to_ptr.hbm [resolvable:$true] %s314_s2 }
  0x29   : > { %1802 = sst [smem:[#allocation24_spill]] %s1603_s24  ;;  %s316_s14 = sshll.u32 %s308_s4, 4  ;;  %s317_s14 = int_to_ptr.vmem [resolvable:$true] %s316_s14 }
  0x2a   : > { %p1103_p2 = pnand %p1115_p3, %p1588_p5  ;;  %s326_s15 = sand.u32 1, %s1446_s10  }
  0x2b   : > { %s305_s27 = scalar_lea.sflag [#allocation6], %s304_s21  ;;  %s1452_s20 = smov 128  }
  0x2c   : > { %s1453_s17 = smov 8   ;;  %s332_s24 = scalar_lea.hbm %s1772_s1, %s1442_s9 }
  0x2d   : > { %1105 = dma.hbm_to_vmem [thread:$0]  (!%p1103_p2), %s315_s2, 256, %s317_s14, %s305_s27, %s1452_s20, %s1452_s20, %s1453_s17  }
  0x2e   : > { %s334_s29 = sshll.u32 %s332_s24, 4  ;;  %s329_s25 = scalar_lea.vmem [#allocation8], %s304_s21  ;;  %s335_s29 = int_to_ptr.hbm [resolvable:$true] %s334_s29 }
  0x2f   : > { %s336_s23 = sshll.u32 %s329_s25, 4  ;;  %s327_s4 = scalar_lea.sflag [#allocation9], %s326_s15  ;;  %s337_s23 = int_to_ptr.vmem [resolvable:$true] %s336_s23 }
  0x30   : > { %1108 = dma.hbm_to_vmem [thread:$0]  (!%p1103_p2), %s335_s29, 16, %s337_s23, %s327_s4  }
  0x31   : > { %345 = sbr.rel (%p1568_p8) target bundleno = 1440 (0x5a0), region = 52  ;;  %s1620_s19 = sand.u32 (!%p1568_p8), 1, %s1430_s28  }
  0x32   : > { %s1035_s2 = sshll.u32 (!%p1568_p8), %s1620_s19, 4  ;;  %s348_s8 = scalar_lea.sflag (!%p1568_p8), [#allocation6], %s1620_s19 }
  0x33   : > { %s351_s27 = scalar_lea.vmem (!%p1568_p8), [#allocation5], %s1035_s2 }
  0x36   : > { %1405 = dma.done.wait (%p1555_p4), %s348_s8, 256  }
  0x37   : > { %1407 = vsyncadd (%p1555_p4), %s348_s8, 4294967040  ;;  %s357_s29 = sand.u32 1, %s1546_s11   ;;  %s360_s18 = scalar_lea.vmem [#allocation8], %s1620_s19 }
  0x38   : > { %s358_s14 = scalar_lea.sflag [#allocation9], %s357_s29 }
  0x39   : > { %1409 = dma.done.wait (%p1555_p4), %s358_s14, 16  }
  0x3a   : > { %1411 = vsyncadd (%p1555_p4), %s358_s14, 4294967280 }
  0x3b   : > { %1413 = dma.done.wait (%p61_p1), [#allocation9], 256  }
  0x3c   : > { %1415 = vsyncadd (%p61_p1), [#allocation9], 4294967040 }
  0x3d   : > { %1417 = dma.done.wait (%p61_p1), [#allocation12], 256  }
  0x3e   : > { %1419 = vsyncadd (%p61_p1), [#allocation12], 4294967040  ;;  %v1076_v0 = vld [vmem:[#allocation10 + $0x8] sm:$0xff]  ;;  %v1075_v1 = vld [vmem:[#allocation10] sm:$0xff]  ;;  %vm433_vm0 = vcmask 261120   ;;  %s1454_s11 = smov 104  }
  0x3f   : > { %v1644_v2 = vld [vmem:[%s351_s27] sm:$0xff]  ;;  %v1646_v3 = vld [vmem:[%s351_s27 + $0x8] sm:$0xff]  ;;  %443 = vmatpush.bf16.msra.mxu0 %v1076_v0  ;;  %s1455_s17 = smov 120   ;;  %s1456_s21 = smov 96   ;;  %vm464_vm1 = vcmask 64512   ;;  %vm485_vm2 = vcmask 130048  }
  0x40   : > { %v412_v4 = vpack.c.bf16 %v1646_v3, %v1644_v2  ;;  %v1189_v6 = vld [vmem:[%s1774_s3] ss:$0 sm:$0xff]  ;;  %s1457_s22 = smov 80   ;;  %s1458_s24 = smov 72   ;;  %vm531_vm3 = vcmask 60416   ;;  %vm611_vm4 = vcmask 126016  }
  0x41   : > { %s1459_s26 = smov 88   ;;  %s1460_s12 = smov 112   ;;  %v1190_v26 = vld [vmem:[%s360_s18] ss:$0 sm:$0xff]  ;;  %vm691_vm5 = vcmask 191616   ;;  %vm771_vm6 = vcmask 257216  }
  0x42   : > { %s1461_s20 = smov 64   ;;  %s1462_s16 = smov 56  }
  0x43   : > { %444 = vmatpush.bf16.msra.mxu0 %v1075_v1  ;;  %s1463_s25 = smov 40   ;;  %s1464_s23 = smov 48  }
  0x44   : > { %s1465_s4 = smov 8   ;;  %s1466_s8 = smov 24  }
  0x45   : > { %s1467_s27 = smov 16  }
  0x46   : > { %1047 = vmatmul.msk.bf16.vlgmr.msra.gmra.mxu0 %vm433_vm0, %v412_v4 }
  0xc3   : > { %v446_v5 = vpop.f32.mrf.mxu0 }
  0xc4   : > { %v447_v7 = vadd.f32 %v1189_v6, %v446_v5 }
  0xc6   : > { %v451_v9 = vpack.c.bf16 %v447_v7, %v447_v7 }
  0xc8   : > { %v459_v12 = vunpack.c.l.b16 %v451_v9 }
  0xcb   : > { %v448_v8 = vpop.f32.mrf.mxu0 }
  0xcc   : > { %v449_v10 = vadd.f32 %v1189_v6, %v448_v8 }
  0xce   : > { %v452_v11 = vpack.c.bf16 %v449_v10, %v449_v10 }
  0xd0   : > { %v460_v13 = vunpack.c.l.b16 %v452_v11 }
  0xd2   : > { %v1654_v14 = vpack.c.b16 %v460_v13, %v459_v12 }
  0xd4   : > { %694 = vrot.lane.b32.xlu2 %v1654_v14, %s1454_s11  ;;  %534 = vrot.lane.b32.xlu1 %v1654_v14, %s1455_s17  ;;  %s1080_s17 = sshll.u32 %s1438_s30, 4  ;;  %s886_s30 = scalar_lea.sflag [#allocation7], %s1620_s19 }
  0xd5   : > { %462 = vrot.lane.b32.xlu0 %v1654_v14, %s1456_s21  ;;  %s407_s21 = scalar_lea.vmem [#allocation13], %s1035_s2 }
  0xdc   : > { %616 = vrot.lane.b32.xlu2 %v1654_v14, %s1457_s22  ;;  %696 = vrot.lane.b32.xlu1 %v1654_v14, %s1458_s24 }
  0xdd   : > { %536 = vrot.lane.b32.xlu0 %v1654_v14, %s1459_s26  ;;  %s1803_s26 = sld [smem:[#allocation27_spill]] }
  0xe3   : > { %s1372_s29 = scalar_lea.hbm %s1803_s26, 32 }
  0xe5   : > { %614 = vrot.lane.b32.xlu0 %v1654_v14, %s1460_s12 }
 0x12e   : > { %v695_v15 = vpop.permute.xlu2 %694 }
 0x136   : > { %v617_v16 = vpop.permute.xlu2 %616 }
 0x137   : > { %v622_v17 = vsel %vm464_vm1, %v617_v16, 0 }
 0x138   : > { %631 = vmatpush.bf16.xpose.msrb.mxu0 %v622_v17 }
 0x146   : > { %v535_v18 = vpop.permute.xlu1 %534 }
 0x147   : > { %v463_v19 = vpop.permute.xlu0 %462 }
 0x148   : > { %v469_v20 = vsel %vm464_vm1, %v463_v19, 0 }
 0x149   : > { %478 = vmatpush.bf16.xpose.msra.mxu1 %v469_v20 }
 0x14e   : > { %v697_v21 = vpop.permute.xlu1 %696 }
 0x14f   : > { %v537_v22 = vpop.permute.xlu0 %536  ;;  %v702_v23 = vsel %vm464_vm1, %v697_v21, 0 }
 0x150   : > { %1048 = vmatmul.msk.bf16.vlgmr.msra.gmra.mxu1 %vm464_vm1, %v1654_v14  ;;  %v542_v24 = vsel %vm464_vm1, %v537_v22, 0 }
 0x151   : > { %551 = vmatpush.bf16.xpose.msra.mxu3 %v542_v24 }
 0x157   : > { %v615_v25 = vpop.permute.xlu0 %614 }
 0x158   : > { %1050 = vmatmul.msk.bf16.vlgmr.msra.gmra.mxu3 %vm464_vm1, %v535_v18  ;;  %1052 = vmatmul.msk.bf16.vlgmr.msrb.gmra.mxu0 %vm464_vm1, %v615_v25 }
 0x159   : > { %711 = vmatpush.bf16.xpose.msrb.mxu3 %v702_v23 }
 0x168   : > { %1054 = vmatmul.msk.bf16.vlgmr.msrb.gmra.mxu3 %vm464_vm1, %v695_v15 }
 0x1cd   : > { %v480_v27 = vpop.f32.mrf.mxu1 }
 0x1ce   : > { %v481_v28 = vadd.f32 %v1190_v26, %v480_v27 }
 0x1d0   : > { %v486_v29 = vsel %vm485_vm2, %v481_v28, -inf }
 0x1d1   : > { %487 = vmax.xlane.f32.xlu1 %v486_v29 }
 0x1d5   : > { %v482_v30 = vpop.f32.mrf.mxu1  ;;  %v633_v31 = vpop.f32.mrf.mxu0 }
 0x1d6   : > { %v483_v32 = vadd.f32 %v1190_v26, %v482_v30  ;;  %v634_v33 = vadd.f32 %v1190_v26, %v633_v31 }
 0x1d8   : > { %v489_v34 = vsel %vm485_vm2, %v483_v32, -inf  ;;  %v638_v35 = vsel %vm485_vm2, %v634_v33, -inf }
 0x1d9   : > { %490 = vmax.xlane.f32.xlu2 %v489_v34  ;;  %639 = vmax.xlane.f32.xlu0 %v638_v35 }
 0x1db   : > { %v553_v36 = vpop.f32.mrf.mxu3 }
 0x1dc   : > { %v554_v37 = vadd.f32 %v1190_v26, %v553_v36 }
 0x1dd   : > { %v635_v38 = vpop.f32.mrf.mxu0 }
 0x1de   : > { %v636_v39 = vadd.f32 %v1190_v26, %v635_v38  ;;  %v558_v41 = vsel %vm485_vm2, %v554_v37, -inf }
 0x1e0   : > { %v641_v40 = vsel %vm485_vm2, %v636_v39, -inf }
 0x1e1   : > { %642 = vmax.xlane.f32.xlu1 %v641_v40  ;;  %559 = vmax.xlane.f32.xlu0 %v558_v41 }
 0x1e3   : > { %v555_v42 = vpop.f32.mrf.mxu3 }
 0x1e4   : > { %v556_v43 = vadd.f32 %v1190_v26, %v555_v42 }
 0x1e6   : > { %v561_v44 = vsel %vm485_vm2, %v556_v43, -inf }
 0x1e7   : > { %562 = vmax.xlane.f32.xlu2 %v561_v44 }
 0x1eb   : > { %v713_v45 = vpop.f32.mrf.mxu3 }
 0x1ec   : > { %v714_v46 = vadd.f32 %v1190_v26, %v713_v45 }
 0x1ee   : > { %v718_v47 = vsel %vm485_vm2, %v714_v46, -inf }
 0x1ef   : > { %719 = vmax.xlane.f32.xlu1 %v718_v47 }
 0x1f3   : > { %v715_v48 = vpop.f32.mrf.mxu3 }
 0x1f4   : > { %v716_v49 = vadd.f32 %v1190_v26, %v715_v48 }
 0x1f6   : > { %v721_v50 = vsel %vm485_vm2, %v716_v49, -inf }
 0x1f7   : > { %722 = vmax.xlane.f32.xlu2 %v721_v50 }
 0x208   : > { %509 = vrot.lane.b32.xlu1 %v1654_v14, %s1461_s20  ;;  %s899_s20 = scalar_lea.hbm %s1803_s26, %s1080_s17 }
 0x20f   : > { %581 = vrot.lane.b32.xlu2 %v1654_v14, %s1462_s16  ;;  %s900_s16 = sshll.u32 %s407_s21, 4  ;;  %s901_s16 = int_to_ptr.vmem [resolvable:$true] %s900_s16 }
 0x244   : > { %v488_v51 = vpop.xlane.xlu1 %487 }
 0x245   : > { %v492_v52 = vsub.f32 %v481_v28, %v488_v51 }
 0x247   : > { %v494_v53 = vmul.f32 1.442695, %v492_v52 }
 0x249   : > { %1194 = vpow2.f32 %v494_v53 }
 0x24c   : > { %v491_v54 = vpop.xlane.xlu2 %490  ;;  %v640_v55 = vpop.xlane.xlu0 %639 }
 0x24d   : > { %v493_v56 = vsub.f32 %v483_v32, %v491_v54  ;;  %v644_v57 = vsub.f32 %v634_v33, %v640_v55 }
 0x24f   : > { %v1684_v58 = vpop.eup %1194  ;;  %v496_v59 = vmul.f32 1.442695, %v493_v56  ;;  %v646_v60 = vmul.f32 1.442695, %v644_v57 }
 0x250   : > { %v498_v61 = vsel %vm485_vm2, %v1684_v58, 0.0 }
 0x251   : > { %1196 = vpow2.f32 %v496_v59  ;;  %499 = vadd.xlane.f32.xlu2 %v498_v61 }
 0x252   : > { %1198 = vpow2.f32 %v646_v60 }
 0x254   : > { %v643_v62 = vpop.xlane.xlu1 %642  ;;  %v560_v63 = vpop.xlane.xlu0 %559 }
 0x255   : > { %v645_v0 = vsub.f32 %v636_v39, %v643_v62  ;;  %v564_v1 = vsub.f32 %v554_v37, %v560_v63 }
 0x257   : > { %v1197_v4 = vpop.eup %1196  ;;  %v648_v5 = vmul.f32 1.442695, %v645_v0  ;;  %v566_v6 = vmul.f32 1.442695, %v564_v1 }
 0x258   : > { %v1688_v7 = vpop.eup %1198  ;;  %v501_v8 = vsel %vm485_vm2, %v1197_v4, 0.0 }
 0x259   : > { %1200 = vpow2.f32 %v648_v5  ;;  %502 = vadd.xlane.f32.xlu0 %v501_v8  ;;  %v650_v9 = vsel %vm485_vm2, %v1688_v7, 0.0 }
 0x25a   : > { %1202 = vpow2.f32 %v566_v6  ;;  %651 = vadd.xlane.f32.xlu1 %v650_v9  ;;  %v563_v10 = vpop.xlane.xlu2 %562 }
 0x25b   : > { %v565_v11 = vsub.f32 %v556_v43, %v563_v10 }
 0x25d   : > { %v568_v12 = vmul.f32 1.442695, %v565_v11 }
 0x25f   : > { %v1693_v13 = vpop.eup %1200  ;;  %1204 = vpow2.f32 %v568_v12 }
 0x260   : > { %v1203_v15 = vpop.eup %1202  ;;  %v653_v16 = vsel %vm485_vm2, %v1693_v13, 0.0 }
 0x261   : > { %654 = vadd.xlane.f32.xlu0 %v653_v16  ;;  %v570_v17 = vsel %vm485_vm2, %v1203_v15, 0.0 }
 0x262   : > { %571 = vadd.xlane.f32.xlu2 %v570_v17  ;;  %v720_v18 = vpop.xlane.xlu1 %719 }
 0x263   : > { %v724_v19 = vsub.f32 %v714_v46, %v720_v18  ;;  %v1079_v18 = vld [vmem:[#allocation11 + $0x8] sm:$0xff] }
 0x264   : > { %810 = vmatpush.bf16.msra.mxu0 %v1079_v18 }
 0x265   : > { %v1205_v20 = vpop.eup %1204  ;;  %v726_v21 = vmul.f32 1.442695, %v724_v19  ;;  %v1078_v19 = vld [vmem:[#allocation11] sm:$0xff] }
 0x266   : > { %v573_v22 = vsel %vm485_vm2, %v1205_v20, 0.0 }
 0x267   : > { %1206 = vpow2.f32 %v726_v21 }
 0x268   : > { %811 = vmatpush.bf16.msra.mxu0 %v1078_v19 }
 0x269   : > { %574 = vadd.xlane.f32.xlu0 %v573_v22 }
 0x26a   : > { %v723_v23 = vpop.xlane.xlu2 %722 }
 0x26b   : > { %v725_v24 = vsub.f32 %v716_v49, %v723_v23 }
 0x26d   : > { %v1207_v25 = vpop.eup %1206  ;;  %v728_v26 = vmul.f32 1.442695, %v725_v24 }
 0x26e   : > { %v730_v27 = vsel %vm485_vm2, %v1207_v25, 0.0 }
 0x26f   : > { %1208 = vpow2.f32 %v728_v26 }
 0x271   : > { %731 = vadd.xlane.f32.xlu0 %v730_v27 }
 0x272   : > { %v582_v31 = vpop.permute.xlu2 %581 }
 0x275   : > { %v1209_v28 = vpop.eup %1208 }
 0x276   : > { %v733_v29 = vsel %vm485_vm2, %v1209_v28, 0.0 }
 0x279   : > { %734 = vadd.xlane.f32.xlu0 %v733_v29 }
 0x27a   : > { %741 = vrot.lane.b32.xlu2 %v1654_v14, %s1463_s25  ;;  %v510_v30 = vpop.permute.xlu1 %509  ;;  %s902_s25 = sshll.u32 %s899_s20, 4  ;;  %s903_s25 = int_to_ptr.hbm [resolvable:$true] %s902_s25 }
 0x27b   : > { %522 = vmatpush.bf16.msra.mxu2 %v510_v30 }
 0x27f   : > { %594 = vmatpush.bf16.msrb.mxu2 %v582_v31 }
 0x28d   : > { %661 = vrot.lane.b32.xlu0 %v1654_v14, %s1464_s23  ;;  %s1366_s23 = sshra.s32 %s903_s25, 4  ;;  %s1367_s23 = int_to_ptr.hbm [resolvable:$true] %s1366_s23 }
 0x28e   : > { %s1368_s2 = scalar_lea.hbm %s1367_s23, 16  ;;  %p1373_p10 = scmp.lt.s32.totalorder %s1367_s23, %s1803_s26 }
 0x28f   : > { %p1369_p1 = scmp.ne.s32.totalorder %s1367_s23, %s1368_s2  ;;  %p1374_p12 = scmp.lt.s32.totalorder %s1372_s29, %s1368_s2 }
 0x291   : > { %p1370_p4 = pnand %p1369_p1, %p1594_p7  ;;  %p1375_p13 = por %p1374_p12, %p1373_p10 }
 0x293   : > { %p1371_p8 = pneg %p1370_p4 }
 0x295   : > { %p1376_p0 = pnand %p1375_p13, %p1371_p8 }
 0x2c4   : > { %v500_v32 = vpop.xlane.xlu2 %499 }
 0x2c5   : > { %1210 = vrcp.f32 %v500_v32 }
 0x2cb   : > { %v1211_v34 = vpop.eup %1210 }
 0x2cc   : > { %v503_v33 = vpop.xlane.xlu0 %502  ;;  %v506_v37 = vmul.f32 %v1211_v34, %v1684_v58  ;;  %v1468_v34 = vmov 32.0  }
 0x2cd   : > { %1212 = vrcp.f32 %v503_v33  ;;  %v652_v51 = vpop.xlane.xlu1 %651 }
 0x2d3   : > { %v1213_v35 = vpop.eup %1212 }
 0x2d4   : > { %v655_v36 = vpop.xlane.xlu0 %654  ;;  %v507_v38 = vmul.f32 %v1213_v35, %v1197_v4 }
 0x2d5   : > { %v572_v39 = vpop.xlane.xlu2 %571 }
 0x2d6   : > { %v508_v40 = vpack.c.bf16 %v507_v38, %v506_v37  ;;  %1214 = vrcp.f32 %v572_v39 }
 0x2d8   : > { %1049 = vmatmul.msk.bf16.vlgmr.msra.gmra.mxu2 %vm485_vm2, %v508_v40 }
 0x2dc   : > { %v575_v41 = vpop.xlane.xlu0 %574  ;;  %v1215_v14 = vpop.eup %1214 }
 0x2dd   : > { %v742_v42 = vpop.permute.xlu2 %741  ;;  %1216 = vrcp.f32 %v575_v41  ;;  %v578_v44 = vmul.f32 %v1215_v14, %v1203_v15 }
 0x2de   : > { %754 = vmatpush.bf16.msra.mxu2 %v742_v42 }
 0x2e3   : > { %v1217_v43 = vpop.eup %1216 }
 0x2e4   : > { %v579_v45 = vmul.f32 %v1217_v43, %v1205_v20  ;;  %v732_v46 = vpop.xlane.xlu0 %731 }
 0x2e5   : > { %1218 = vrcp.f32 %v732_v46 }
 0x2e6   : > { %v580_v47 = vpack.c.bf16 %v579_v45, %v578_v44 }
 0x2e8   : > { %1051 = vmatmul.msk.bf16.vlgmr.msrb.gmra.mxu2 %vm485_vm2, %v580_v47 }
 0x2eb   : > { %v1219_v49 = vpop.eup %1218 }
 0x2ec   : > { %v735_v48 = vpop.xlane.xlu0 %734  ;;  %v738_v52 = vmul.f32 %v1219_v49, %v1207_v25  ;;  %v1191_v25 = vld [vmem:[%s1776_s5] ss:$0 sm:$0xff] }
 0x2ed   : > { %1220 = vrcp.f32 %v735_v48 }
 0x2ee   : > { %1222 = vrcp.f32 %v655_v36 }
 0x2ef   : > { %1224 = vrcp.f32 %v652_v51 }
 0x2f0   : > { %1226 = vrcp.f32 %v1468_v34 }
 0x2f3   : > { %v1221_v50 = vpop.eup %1220 }
 0x2f4   : > { %v739_v53 = vmul.f32 %v1221_v50, %v1209_v28  ;;  %v1223_v55 = vpop.eup %1222 }
 0x2f5   : > { %v1225_v56 = vpop.eup %1224  ;;  %v659_v57 = vmul.f32 %v1223_v55, %v1693_v13 }
 0x2f6   : > { %v740_v54 = vpack.c.bf16 %v739_v53, %v738_v52  ;;  %v658_v58 = vmul.f32 %v1225_v56, %v1688_v7  ;;  %v1227_v35 = vpop.eup %1226 }
 0x2f7   : > { %v827_v36 = vmul.f32 32.0, %v1227_v35  ;;  %vm831_vm7 = vweird.f32 %v1227_v35 }
 0x2f8   : > { %1055 = vmatmul.msk.bf16.vlgmr.msra.gmra.mxu2 %vm485_vm2, %v740_v54  ;;  %v660_v60 = vpack.c.bf16 %v659_v57, %v658_v58 }
 0x2f9   : > { %v828_v37 = vsub.f32 1.0, %v827_v36 }
 0x2fb   : > { %v829_v38 = vmul.f32 %v1227_v35, %v828_v37 }
 0x2fd   : > { %v830_v39 = vadd.f32 %v1227_v35, %v829_v38 }
 0x2ff   : > { %v662_v59 = vpop.permute.xlu0 %661  ;;  %v832_v40 = vsel %vm831_vm7, %v1227_v35, %v830_v39 }
 0x300   : > { %674 = vmatpush.bf16.msrb.mxu1 %v662_v59 }
 0x303   : > { %1053 = vmatmul.msk.bf16.vlgmr.msrb.gmra.mxu1 %vm485_vm2, %v660_v60 }
 0x35b   : > { %v524_v61 = vpop.f32.mrf.mxu2 }
 0x35c   : > { %v529_v62 = vpack.c.bf16 %v524_v61, %v524_v61 }
 0x35e   : > { %532 = vst.msk [vmem:[#allocation4] sm:$0xf] %vm531_vm3, %v529_v62  ;;  %v1192_v62 = vld [vmem:[%s1777_s6] ss:$0 sm:$0xff] }
 0x363   : > { %v526_v63 = vpop.f32.mrf.mxu2 }
 0x364   : > { %v530_v0 = vpack.c.bf16 %v526_v63, %v526_v63 }
 0x366   : > { %533 = vst.msk [vmem:[#allocation4 + $0x4] sm:$0xf] %vm531_vm3, %v530_v0 }
 0x36b   : > { %v596_v1 = vpop.f32.mrf.mxu2 }
 0x36c   : > { %v601_v4 = vpack.c.bf16 %v596_v1, %v596_v1  ;;  %v1193_v1 = vld [vmem:[%s1778_s7] ss:$0 sm:$0xff] }
 0x36e   : > { %605 = vrot.lane.b32.xlu2 %v601_v4, %s1465_s4 }
 0x373   : > { %v598_v5 = vpop.f32.mrf.mxu2 }
 0x374   : > { %v602_v6 = vpack.c.bf16 %v598_v5, %v598_v5 }
 0x376   : > { %607 = vrot.lane.b32.xlu2 %v602_v6, %s1465_s4 }
 0x37b   : > { %v756_v7 = vpop.f32.mrf.mxu2 }
 0x37c   : > { %v761_v8 = vpack.c.bf16 %v756_v7, %v756_v7 }
 0x37e   : > { %765 = vrot.lane.b32.xlu1 %v761_v8, %s1466_s8 }
 0x380   : > { %v676_v9 = vpop.f32.mrf.mxu1 }
 0x381   : > { %v681_v10 = vpack.c.bf16 %v676_v9, %v676_v9 }
 0x383   : > { %685 = vrot.lane.b32.xlu0 %v681_v10, %s1467_s27  ;;  %v758_v11 = vpop.f32.mrf.mxu2 }
 0x384   : > { %v762_v13 = vpack.c.bf16 %v758_v11, %v758_v11 }
 0x388   : > { %v678_v12 = vpop.f32.mrf.mxu1 }
 0x389   : > { %v682_v15 = vpack.c.bf16 %v678_v12, %v678_v12 }
 0x38b   : > { %767 = vrot.lane.b32.xlu0 %v762_v13, %s1466_s8  ;;  %687 = vrot.lane.b32.xlu2 %v682_v15, %s1467_s27 }
 0x3c8   : > { %v606_v16 = vpop.permute.xlu2 %605 }
 0x3c9   : > { %612 = vst.msk [vmem:[#allocation4] sm:$0xf] %vm611_vm4, %v606_v16 }
 0x3d0   : > { %v608_v17 = vpop.permute.xlu2 %607 }
 0x3d1   : > { %613 = vst.msk [vmem:[#allocation4 + $0x4] sm:$0xf] %vm611_vm4, %v608_v17 }
 0x3e5   : > { %v688_v20 = vpop.permute.xlu2 %687 }
 0x3e6   : > { %693 = vst.msk [vmem:[#allocation4 + $0x4] sm:$0xf] %vm691_vm5, %v688_v20 }
 0x3f0   : > { %v766_v22 = vpop.permute.xlu1 %765 }
 0x3f5   : > { %v686_v21 = vpop.permute.xlu0 %685 }
 0x3f6   : > { %692 = vst.msk [vmem:[#allocation4] sm:$0xf] %vm691_vm5, %v686_v21 }
 0x3f7   : > { %772 = vst.msk [vmem:[#allocation4] sm:$0xf] %vm771_vm6, %v766_v22 }
 0x3fd   : > { %v768_v23 = vpop.permute.xlu0 %767 }
 0x3fe   : > { %773 = vst.msk [vmem:[#allocation4 + $0x4] sm:$0xf] %vm771_vm6, %v768_v23 }
 0x405   : > { %v1077_v24 = vld [vmem:[#allocation4] sm:$0xff] }
 0x406   : > { %1068 = vmatmul.msk.bf16.vlgmr.msra.gmra.mxu0 %vm433_vm0, %v1077_v24 }
 0x483   : > { %v813_v26 = vpop.f32.mrf.mxu0 }
 0x484   : > { %v814_v27 = vadd.f32 %v1191_v25, %v813_v26 }
 0x486   : > { %v818_v28 = vadd.f32 %v814_v27, %v1644_v2 }
 0x488   : > { %v820_v29 = vsel %vm433_vm0, %v818_v28, 0.0 }
 0x489   : > { %821 = vadd.xlane.f32.xlu2 %v820_v29 }
 0x48b   : > { %v815_v30 = vpop.f32.mrf.mxu0 }
 0x48c   : > { %v816_v31 = vadd.f32 %v1191_v25, %v815_v30 }
 0x48e   : > { %v819_v32 = vadd.f32 %v816_v31, %v1646_v3 }
 0x490   : > { %v823_v33 = vsel %vm433_vm0, %v819_v32, 0.0 }
 0x491   : > { %824 = vadd.xlane.f32.xlu0 %v823_v33 }
 0x4fc   : > { %v822_v2 = vpop.xlane.xlu2 %821 }
 0x4fd   : > { %v833_v41 = vmul.f32 %v832_v40, %v822_v2 }
 0x4ff   : > { %v835_v42 = vsub.f32 %v818_v28, %v833_v41 }
 0x501   : > { %v837_v14 = vmul.f32 %v835_v42, %v835_v42 }
 0x503   : > { %v839_v43 = vsel %vm433_vm0, %v837_v14, 0.0 }
 0x504   : > { %v825_v44 = vpop.xlane.xlu0 %824  ;;  %840 = vadd.xlane.f32.xlu1 %v839_v43 }
 0x505   : > { %v834_v3 = vmul.f32 %v832_v40, %v825_v44 }
 0x507   : > { %v836_v45 = vsub.f32 %v819_v32, %v834_v3 }
 0x509   : > { %v838_v46 = vmul.f32 %v836_v45, %v836_v45 }
 0x50b   : > { %v842_v47 = vsel %vm433_vm0, %v838_v46, 0.0 }
 0x50c   : > { %843 = vadd.xlane.f32.xlu2 %v842_v47 }
 0x577   : > { %v841_v48 = vpop.xlane.xlu1 %840 }
 0x578   : > { %v845_v49 = vmul.f32 %v841_v48, %v832_v40 }
 0x57a   : > { %v847_v50 = vadd.f32 1e-12, %v845_v49 }
 0x57c   : > { %1228 = vrsqrt.f32 %v847_v50  ;;  %vm855_vm9 = vweird.f32 %v847_v50 }
 0x57f   : > { %v844_v51 = vpop.xlane.xlu2 %843 }
 0x580   : > { %v846_v52 = vmul.f32 %v844_v51, %v832_v40 }
 0x582   : > { %v1229_v53 = vpop.eup %1228  ;;  %v848_v54 = vadd.f32 1e-12, %v846_v52 }
 0x583   : > { %v850_v55 = vmul.f32 %v1229_v53, %v847_v50  ;;  %vm856_vm8 = vweird.f32 %v1229_v53 }
 0x584   : > { %1230 = vrsqrt.f32 %v848_v54  ;;  %vm857_vm10 = vmor %vm855_vm9, %vm856_vm8  ;;  %vm865_vm12 = vweird.f32 %v848_v54 }
 0x585   : > { %v851_v56 = vmul.f32 %v1229_v53, %v850_v55 }
 0x587   : > { %v852_v57 = vmul.f32 0.5, %v851_v56 }
 0x589   : > { %v853_v58 = vsub.f32 1.5, %v852_v57 }
 0x58a   : > { %v1231_v59 = vpop.eup %1230 }
 0x58b   : > { %v854_v60 = vmul.f32 %v1229_v53, %v853_v58  ;;  %v860_v61 = vmul.f32 %v1231_v59, %v848_v54  ;;  %vm866_vm11 = vweird.f32 %v1231_v59 }
 0x58c   : > { %vm867_vm13 = vmor %vm865_vm12, %vm866_vm11 }
 0x58d   : > { %v858_v63 = vsel %vm857_vm10, %v1229_v53, %v854_v60  ;;  %v861_v0 = vmul.f32 %v1231_v59, %v860_v61 }
 0x58e   : > { %v869_v4 = vmul.f32 %v858_v63, %v835_v42 }
 0x58f   : > { %v862_v5 = vmul.f32 0.5, %v861_v0 }
 0x590   : > { %v875_v6 = vmul.f32 %v1192_v62, %v869_v4 }
 0x591   : > { %v863_v7 = vsub.f32 1.5, %v862_v5 }
 0x592   : > { %v881_v8 = vadd.f32 %v1193_v1, %v875_v6 }
 0x593   : > { %v864_v9 = vmul.f32 %v1231_v59, %v863_v7 }
 0x594   : > { %883 = vst.msk [vmem:[%s407_s21] sm:$0xff] %vm433_vm0, %v881_v8 }
 0x595   : > { %v868_v10 = vsel %vm867_vm13, %v1231_v59, %v864_v9 }
 0x596   : > { %v870_v11 = vmul.f32 %v868_v10, %v836_v45 }
 0x598   : > { %v876_v12 = vmul.f32 %v1192_v62, %v870_v11 }
 0x59a   : > { %v882_v13 = vadd.f32 %v1193_v1, %v876_v12 }
 0x59c   : > { %884 = vst.msk [vmem:[%s407_s21 + $0x8] sm:$0xff] %vm433_vm0, %v882_v13 }
 0x59d   : > { %1379 = shalt.err (!%p1376_p0)
}
 0x59e   : > { %s1469_s19 = smov 128  }
 0x59f   : > { %1093 = dma.vmem_to_hbm [thread:$0]  (%p1594_p7), %s901_s16, 256, %s903_s25, %s886_s30, %s1469_s19, %s1469_s19, %s1465_s4  }
 0x5a0 PF: > { %s1805_s13 = sld [smem:[#allocation19_spill]]  ;;  %p1110_p3 = pnand %p1030_p11, %p1560_p6 }
 0x5a2   : > { %p1111_p5 = pneg %p1110_p3 }
 0x5a6   : > { %s917_s11 = sand.u32 1, %s1805_s13  }
 0x5a7   : > { %s918_s17 = scalar_lea.sflag [#allocation7], %s917_s11 }
 0x5a8   : > { %1421 = dma.done.wait (%p1111_p5), %s918_s17, 256  }
 0x5a9   : > { %1423 = vsyncadd (%p1111_p5), %s918_s17, 4294967040  ;;  %s28_s10 = sadd.s32 1, %s1446_s10   ;;  %s1807_s21 = sld [smem:[#allocation20_spill]] }
 0x5aa   : > { %p25_p9 = scmp.ge.s32.totalorder %s28_s10, 4   ;;  %s1808_s29 = sld [smem:[#allocation24_spill]] }
 0x5ab   : > { %s1809_s4 = sld [smem:[#allocation22_spill]]  ;;  %s1810_s27 = smov %s1430_s28 }
 0x5ac   : > { %s1812_s30 = smov %s1442_s9 }
 0x5ad   :  { %27 = sbr.rel (!%p25_p9) target bundleno = 13 (0xd), region = 118 }
 0x5af   : > { %s1811_s28 = smov %s1807_s21 }
 0x5b1   : > { %s1813_s9 = smov %s1809_s4 }
 0x5b2   :  { %924 = vsyncpa [#allocation6], 1 }
 0x5b3   :  { %926 = vsyncpa [#allocation6 + $0x1], 1 }
 0x5b4   :  { %927 = vsyncpa [#allocation9], 1 }
 0x5b5   :  { %929 = vsyncpa [#allocation9 + $0x1], 1 }
 0x5b6   :  { %930 = vsyncpa [#allocation12], 1 }
 0x5b7   :  { %931 = vsyncpa [#allocation7], 1 }
 0x5b8   :  { %933 = vsyncpa [#allocation7 + $0x1], 1 }

</bundles_post_ra>
